<compile_context>
chip_gen: v7x
topology: tpu7x:2x2x1
jax: 0.10.0
libtpu: 0.0.40
codegen_flags: <defaults>
</compile_context>

<pallas_src>
import math
from functools import partial

import numpy as np
import jax
import jax.numpy as jnp
from jax.experimental import pallas as pl
from jax.experimental.pallas import tpu as pltpu

_VMEM_LIMIT = 32 * 1024 * 1024  # explicit scoped-VMEM budget (>= default everywhere, safe on v7x)


def _pick_group(bh, per_pair_bytes, budget=4 * 1024 * 1024):
    """Largest G dividing BH whose per-step blocks stay well inside VMEM (double-buffered)."""
    g = 1
    for cand in (2, 4, 8, 16):
        if bh % cand == 0 and cand * per_pair_bytes <= budget:
            g = cand
    return g


# ----------------------------- Pallas kernels --------------------------------

def _sample_score_kernel(q_ref, k_ref, cnt_ref, m_ref, *, inv_lk):
    """Per group of G (b,h) pairs and one query tile:
         S = Q @ K^T                                           (MXU, f32 accumulation)
         M[l] = max_{k in sampled(l)} S[l,k] - (1/L_K) * sum_k cnt[l,k] * S[l,k]
       cnt[l,k] = multiplicity of key k among the random samples for query l, so this is
       bit-for-bit the reference sampled-QK measure (duplicates included in the sum)
       without ever materializing K_sample."""
    q = q_ref[...]                                             # [G, tq, D]
    k = k_ref[...]                                             # [G, L_K, D]
    cnt = cnt_ref[...]                                         # [tq, L_K] shared over (b,h)
    s = jnp.einsum('gqd,gkd->gqk', q, k,
                   preferred_element_type=jnp.float32)         # [G, tq, L_K]  (MXU)
    sampled = (cnt > 0.0)[None, :, :]
    smax = jnp.max(jnp.where(sampled, s, -jnp.inf), axis=-1)   # [G, tq]
    ssum = jnp.sum(s * cnt[None, :, :], axis=-1)               # [G, tq]
    m_ref[...] = (smax - ssum * inv_lk)[:, None, :]            # [G, 1, tq]  lane-dense store


def _prob_attn_kernel(idx_smem, qr_ref, k_ref, v_ref, ctx_ref, idxc_ref, out_ref,
                      *, scale, u, group):
    """Per group of G (b,h) pairs: masked softmax attention for the top-u queries, then
       scatter the updated rows into the precomputed cumsum(V) initial context."""
    bh0 = pl.program_id(0) * group
    qr = qr_ref[...]                                           # [G, u_pad, D]
    k = k_ref[...]                                             # [G, L_K, D]
    v = v_ref[...]                                             # [G, L_V, D]

    # scores = Q_reduce @ K^T * scale  (MXU, batched over the G pairs)
    scores = jnp.einsum('gud,gkd->guk', qr, k,
                        preferred_element_type=jnp.float32) * scale
    # ProbMask: mask[i, j] = j > index[i]  (triu(1) gathered at the selected rows)
    kid = jax.lax.broadcasted_iota(jnp.int32, scores.shape, 2)
    scores = jnp.where(kid > idxc_ref[...], -jnp.inf, scores)

    # softmax over keys, kept in f32 (v5e VPU/EUP have no bf16 path)
    smax = jnp.max(scores, axis=-1, keepdims=True)
    p = jnp.exp(scores - smax)
    attn = p / jnp.sum(p, axis=-1, keepdims=True)
    upd = jnp.einsum('guk,gkd->gud', attn.astype(v.dtype), v,
                     preferred_element_type=jnp.float32).astype(out_ref.dtype)

    # initial context = cumsum(V) computed in the wrapper; copy then overwrite u rows
    out_ref[...] = ctx_ref[...]
    # u (~factor*ln L) cheap dynamic row stores per pair; row indices come from SMEM.
    for gg in range(group):
        for j in range(u):
            row = idx_smem[bh0 + gg, j]
            out_ref[gg:gg + 1, pl.ds(row, 1), :] = upd[gg:gg + 1, j:j + 1, :]


# ----------------------------- wrapper (glue) ---------------------------------

def prob_attention(queries, keys, values, attn_mask=None, *, factor=3,
                   scale=None, sample_key=None):
    """ProbAttention.forward with mask_flag=True, output_attention=False,
    dropout unused (as in the reference forward). Returns (context, None)."""
    B, L_Q, H, D = queries.shape
    _, L_K, _, _ = keys.shape
    L_V = values.shape[1]
    BH = B * H

    Q = jnp.transpose(queries, (0, 2, 1, 3)).reshape(BH, L_Q, D)
    K = jnp.transpose(keys, (0, 2, 1, 3)).reshape(BH, L_K, D)
    V = jnp.transpose(values, (0, 2, 1, 3)).reshape(BH, L_V, D)

    U_part = min(factor * int(np.ceil(np.log(L_K))), L_K)   # sampled keys per query
    u = min(factor * int(np.ceil(np.log(L_Q))), L_Q)        # top queries kept

    # random key-index sampling (shared across batch & heads, like torch.randint).
    # Instead of gathering K_sample [BH, L_Q, S, D] into HBM, only the (L_Q, L_K)
    # sample-multiplicity matrix is shipped to the kernel.
    index_sample = jax.random.randint(sample_key, (L_Q, U_part), 0, L_K)
    counts = jnp.zeros((L_Q, L_K), jnp.float32).at[
        jnp.arange(L_Q)[:, None], index_sample].add(1.0)

    itemsize = jnp.dtype(queries.dtype).itemsize
    per_pair = (L_Q + L_K + 3 * L_V) * D * itemsize
    G = _pick_group(BH, per_pair)
    tq = 256 if L_Q % 256 == 0 else (128 if L_Q % 128 == 0 else L_Q)

    # --- kernel 1: MXU scores + sampled-max / weighted-sum sparsity measure M ---
    M = pl.pallas_call(
        partial(_sample_score_kernel, inv_lk=1.0 / L_K),
        out_shape=jax.ShapeDtypeStruct((BH, 1, L_Q), jnp.float32),
        grid=(BH // G, L_Q // tq),
        in_specs=[
            pl.BlockSpec((G, tq, D), lambda i, qi: (i, qi, 0)),
            pl.BlockSpec((G, L_K, D), lambda i, qi: (i, 0, 0)),
            pl.BlockSpec((tq, L_K), lambda i, qi: (qi, 0)),
        ],
        out_specs=pl.BlockSpec((G, 1, tq), lambda i, qi: (i, 0, qi)),
        compiler_params=pltpu.CompilerParams(
            dimension_semantics=("parallel", "parallel"),
            vmem_limit_bytes=_VMEM_LIMIT),
    )(Q, K, counts)

    # TODO(synk): top-k query selection has no clean Pallas equivalent; done in JAX.
    index = jax.lax.top_k(M[:, 0, :], u)[1].astype(jnp.int32)          # [BH, u]
    Q_reduce = jnp.take_along_axis(Q, index[:, :, None], axis=1)       # [BH, u, D]

    # pad the top-u rows to a sublane multiple; padded rows are masked to column 0
    # only and are never scattered back, so they do not affect the output.
    u_pad = int(np.ceil(u / 8)) * 8
    if u_pad != u:
        Q_reduce = jnp.pad(Q_reduce, ((0, 0), (0, u_pad - u), (0, 0)))
        index_pad = jnp.pad(index, ((0, 0), (0, u_pad - u)))
    else:
        index_pad = index
    idx_col = index_pad[:, :, None]                                    # [BH, u_pad, 1]

    # initial context = cumsum(V) along the sequence — exactly the reference op,
    # computed once in the wrapper (O(L*D)) instead of an O(L^2*D) in-kernel matmul.
    ctx_init = jnp.cumsum(V, axis=1).astype(values.dtype)

    scale_v = float(scale) if scale is not None else 1.0 / math.sqrt(D)

    # --- kernel 2: masked softmax attention for the top queries + row scatter ---
    grid_spec = pltpu.PrefetchScalarGridSpec(
        num_scalar_prefetch=1,                 # `index` lands in SMEM for the scatter
        grid=(BH // G,),
        in_specs=[
            pl.BlockSpec((G, u_pad, D), lambda i, idx: (i, 0, 0)),
            pl.BlockSpec((G, L_K, D), lambda i, idx: (i, 0, 0)),
            pl.BlockSpec((G, L_V, D), lambda i, idx: (i, 0, 0)),
            pl.BlockSpec((G, L_V, D), lambda i, idx: (i, 0, 0)),
            pl.BlockSpec((G, u_pad, 1), lambda i, idx: (i, 0, 0)),
        ],
        out_specs=pl.BlockSpec((G, L_V, D), lambda i, idx: (i, 0, 0)),
    )
    ctx = pl.pallas_call(
        partial(_prob_attn_kernel, scale=scale_v, u=u, group=G),
        out_shape=jax.ShapeDtypeStruct((BH, L_V, D), values.dtype),
        grid_spec=grid_spec,
        compiler_params=pltpu.CompilerParams(
            dimension_semantics=("parallel",),
            vmem_limit_bytes=_VMEM_LIMIT),
    )(index, Q_reduce, K, V, ctx_init, idx_col)

    ctx = ctx.reshape(B, H, L_V, D).transpose(0, 2, 1, 3)   # [B, L_Q, H, D]
    return ctx, None


# ----------------------------- pure-JAX reference -----------------------------

def prob_attention_ref(queries, keys, values, *, factor=3, scale=None, sample_key=None):
    B, L_Q, H, D = queries.shape
    _, L_K, _, _ = keys.shape
    Q = jnp.transpose(queries, (0, 2, 1, 3))
    K = jnp.transpose(keys, (0, 2, 1, 3))
    V = jnp.transpose(values, (0, 2, 1, 3))
    U_part = min(factor * int(np.ceil(np.log(L_K))), L_K)
    u = min(factor * int(np.ceil(np.log(L_Q))), L_Q)
    index_sample = jax.random.randint(sample_key, (L_Q, U_part), 0, L_K)
    K_sample = K[:, :, index_sample, :]
    QKs = jnp.einsum('bhld,bhlsd->bhls', Q, K_sample)
    M = QKs.max(-1) - QKs.sum(-1) / L_K
    index = jax.lax.top_k(M, u)[1]
    Q_reduce = jnp.take_along_axis(Q, index[..., None], axis=2)
    sc = scale if scale is not None else 1.0 / math.sqrt(D)
    scores = jnp.einsum('bhud,bhkd->bhuk', Q_reduce, K) * sc
    mask = jnp.arange(L_K)[None, None, None, :] > index[..., None]
    scores = jnp.where(mask, -jnp.inf, scores)
    attn = jax.nn.softmax(scores, axis=-1)
    upd = jnp.einsum('bhuk,bhkd->bhud', attn, V)
    ctx = jnp.cumsum(V, axis=2)
    bidx = jnp.arange(B)[:, None, None]
    hidx = jnp.arange(H)[None, :, None]
    ctx = ctx.at[bidx, hidx, index, :].set(upd)
    return jnp.transpose(ctx, (0, 2, 1, 3))


# ----------------------------------- main --------------------------------------

if __name__ == "__main__":
    B, L, H, D = 2, 16, 4, 32
    root = jax.random.PRNGKey(0)
    kq, kk, kv, ksamp = jax.random.split(root, 4)
    queries = jax.random.normal(kq, (B, L, H, D), jnp.float32)
    keys = jax.random.normal(kk, (B, L, H, D), jnp.float32)
    values = jax.random.normal(kv, (B, L, H, D), jnp.float32)

    out, attn = prob_attention(queries, keys, values, None, sample_key=ksamp)
    out = jax.block_until_ready(out)
    assert out.shape == (B, L, H, D)
    assert attn is None

    ref = prob_attention_ref(queries, keys, values, sample_key=ksamp)
    np.testing.assert_allclose(np.asarray(out), np.asarray(ref), rtol=2e-3, atol=2e-3)

    print("KERNEL_OK")
</pallas_src>

<mosaic_0001>
module attributes {stable_mosaic.version = 11 : i64} {
  func.func @_sample_score_kernel(%arg0: i32, %arg1: i32, %arg2: memref<8x16x32xf32, #tpu.memory_space<vmem>>, %arg3: memref<8x16x32xf32, #tpu.memory_space<vmem>>, %arg4: memref<16x16xf32, #tpu.memory_space<vmem>>, %arg5: memref<8x1x16xf32, #tpu.memory_space<vmem>>) attributes {dimension_semantics = [#tpu.dimension_semantics<parallel>, #tpu.dimension_semantics<parallel>], iteration_bounds = array<i64: 1, 1>, scalar_prefetch = 0 : i64, scratch_operands = 0 : i64, tpu.core_type = #tpu.core_type<tc>, window_params = [{transform_indices = @transform_0, window_bounds = array<i64: 8, 16, 32>}, {transform_indices = @transform_1, window_bounds = array<i64: 8, 16, 32>}, {transform_indices = @transform_2, window_bounds = array<i64: 16, 16>}, {transform_indices = @transform_3, window_bounds = array<i64: 8, 1, 16>}]} {
    %c0 = arith.constant 0 : index
    %c0_0 = arith.constant 0 : index
    %c0_1 = arith.constant 0 : index
    %0 = vector.load %arg2[%c0, %c0_0, %c0_1] : memref<8x16x32xf32, #tpu.memory_space<vmem>>, vector<8x16x32xf32>
    %c0_2 = arith.constant 0 : index
    %c0_3 = arith.constant 0 : index
    %c0_4 = arith.constant 0 : index
    %1 = vector.load %arg3[%c0_2, %c0_3, %c0_4] : memref<8x16x32xf32, #tpu.memory_space<vmem>>, vector<8x16x32xf32>
    %c0_5 = arith.constant 0 : index
    %c0_6 = arith.constant 0 : index
    %2 = vector.load %arg4[%c0_5, %c0_6] : memref<16x16xf32, #tpu.memory_space<vmem>>, vector<16x16xf32>
    "tpu.trace_start"() <{level = 10 : i32, message = "gqd,gkd->gqk"}> : () -> ()
    %cst = arith.constant dense<0.000000e+00> : vector<8x16x16xf32>
    %3 = tpu.matmul %0, %1, %cst {dimension_numbers = #tpu.dot_dimension_numbers<[2], [2], [1], [1], [0, 0, 0, 1, 1, 1], [0], [0]>} : vector<8x16x32xf32>, vector<8x16x32xf32>, vector<8x16x16xf32> -> vector<8x16x16xf32>
    %cst_7 = arith.constant 0.000000e+00 : f32
    "tpu.trace_stop"() : () -> ()
    %4 = vector.broadcast %cst_7 : f32 to vector<16x16xf32>
    %5 = arith.cmpf ogt, %2, %4 : vector<16x16xf32>
    %6 = vector.shape_cast %5 : vector<16x16xi1> to vector<1x16x16xi1>
    %cst_8 = arith.constant 0xFF800000 : f32
    %7 = vector.shape_cast %6 : vector<1x16x16xi1> to vector<1x16x16xi1>
    %8 = vector.broadcast %7 : vector<1x16x16xi1> to vector<8x16x16xi1>
    %9 = vector.broadcast %cst_8 : f32 to vector<8x16x16xf32>
    %10 = arith.select %8, %3, %9 : vector<8x16x16xi1>, vector<8x16x16xf32>
    %cst_9 = arith.constant dense<0xFF800000> : vector<8x16xf32>
    %11 = vector.multi_reduction <maximumf>, %10, %cst_9 [2] : vector<8x16x16xf32> to vector<8x16xf32>
    %12 = vector.shape_cast %2 : vector<16x16xf32> to vector<1x16x16xf32>
    %13 = vector.broadcast %12 : vector<1x16x16xf32> to vector<8x16x16xf32>
    %14 = arith.mulf %3, %13 : vector<8x16x16xf32>
    %cst_10 = arith.constant dense<0.000000e+00> : vector<8x16xf32>
    %15 = vector.multi_reduction <add>, %14, %cst_10 [2] : vector<8x16x16xf32> to vector<8x16xf32>
    %cst_11 = arith.constant 6.250000e-02 : f32
    %16 = vector.broadcast %cst_11 : f32 to vector<8x16xf32>
    %17 = arith.mulf %15, %16 : vector<8x16xf32>
    %18 = arith.subf %11, %17 : vector<8x16xf32>
    %19 = vector.shape_cast %18 : vector<8x16xf32> to vector<8x1x16xf32>
    %c0_12 = arith.constant 0 : index
    %c0_13 = arith.constant 0 : index
    %c0_14 = arith.constant 0 : index
    %20 = vector.load %arg5[%c0_12, %c0_13, %c0_14] : memref<8x1x16xf32, #tpu.memory_space<vmem>>, vector<8x1x16xf32>
    tpu.vector_store %arg5[%c0_12, %c0_13, %c0_14], %19 {strides = array<i32>} : memref<8x1x16xf32, #tpu.memory_space<vmem>>, vector<8x1x16xf32>,
    return
  }
  func.func @transform_0(%arg0: i32, %arg1: i32) -> (i32, i32, i32) {
    %c0_i32 = arith.constant 0 : i32
    %c0_i32_0 = arith.constant 0 : i32
    return %arg0, %arg1, %c0_i32 : i32, i32, i32
  }
  func.func @transform_1(%arg0: i32, %arg1: i32) -> (i32, i32, i32) {
    %c0_i32 = arith.constant 0 : i32
    %c0_i32_0 = arith.constant 0 : i32
    %c0_i32_1 = arith.constant 0 : i32
    return %arg0, %c0_i32, %c0_i32_0 : i32, i32, i32
  }
  func.func @transform_2(%arg0: i32, %arg1: i32) -> (i32, i32) {
    %c0_i32 = arith.constant 0 : i32
    %c0_i32_0 = arith.constant 0 : i32
    return %arg1, %c0_i32 : i32, i32
  }
  func.func @transform_3(%arg0: i32, %arg1: i32) -> (i32, i32, i32) {
    %c0_i32 = arith.constant 0 : i32
    %c0_i32_0 = arith.constant 0 : i32
    return %arg0, %c0_i32, %arg1 : i32, i32, i32
  }
}

</mosaic_0001>

<bundles_post_ra>
// kernel: tpu_custom_call.1
= control target key start
LH: loop header
LB: loop body
LE: loop exit
PB: predicated region body
PF: predicated region fallthrough
CT: control target
= control target key end

     0   :  { %8 = vsyncpa [#allocation3], 0  ;;  %s1619_s0 = inlined_call_operand.hbm [shape: f32[8,16,32], index: 0, kind: input, shape index: {}]   ;;  %s1620_s1 = inlined_call_operand.hbm [shape: f32[8,16,32], index: 1, kind: input, shape index: {}]   ;;  %s1621_s2 = inlined_call_operand.hbm [shape: f32[16,16], index: 2, kind: input, shape index: {}]   ;;  %s1622_s3 = inlined_call_operand.hbm [shape: f32[8,1,16], index: 3, kind: output, shape index: {}]  }
   0x1   :  { %9 = vsyncpa [#allocation6], 0 }
   0x2   :  { %10 = vsyncpa [#allocation4], 0  ;;  %s1351_s12 = smov [#allocation5]   ;;  %s1352_s14 = smov [#allocation2]  }
   0x3   :  { %s28_s13 = sshll.u32 %s1351_s12, 4  ;;  %s16_s15 = sshll.u32 %s1352_s14, 4  ;;  %s29_s13 = int_to_ptr.vmem [resolvable:$true] %s28_s13  ;;  %s1379_s15 = int_to_ptr.vmem [resolvable:$true] %s16_s15 }
   0x4   :  { %s1257_s18 = scalar_lea.hbm %s1620_s1, 2048 }
   0x5   :  { %p1258_p0 = scmp.ne.s32.totalorder %s1620_s1, %s1257_s18  ;;  %p1261_p1 = scmp.lt.u32.totalorder %s1257_s18, %s1620_s1 }
   0x7   :  { %p1263_p2 = pnand %p1261_p1, %p1258_p0 }
   0x9   :  { %1266 = shalt.err (!%p1263_p2)
}
   0xa   :  { %s1267_s23 = scalar_lea.vmem %s29_s13, 2048  ;;  %p1272_p4 = scmp.lt.s32.totalorder %s29_s13, %s29_s13 }
   0xb   :  { %p1268_p3 = scmp.ne.s32.totalorder %s29_s13, %s1267_s23  ;;  %p1273_p5 = scmp.lt.s32.totalorder %s1267_s23, %s1267_s23 }
   0xd   :  { %p1274_p6 = por %p1273_p5, %p1272_p4 }
   0xf   :  { %p1275_p7 = pnand %p1274_p6, %p1268_p3 }
  0x11   :  { %1278 = shalt.err (!%p1275_p7)
}
  0x12   :  { %s1353_s24 = smov 128   ;;  %s1354_s25 = smov 8  }
  0x13   :  { %34 = dma.hbm_to_vmem [thread:$0]  %s1620_s1, 2048, %s29_s13, [#allocation6], %s1353_s24, %s1353_s24, %s1354_s25  }
  0x14   :  { %s1279_s30 = scalar_lea.hbm %s1619_s0, 2048 }
  0x15   :  { %p1280_p8 = scmp.ne.s32.totalorder %s1619_s0, %s1279_s30  ;;  %p1283_p9 = scmp.lt.u32.totalorder %s1279_s30, %s1619_s0 }
  0x17   :  { %p1285_p10 = pnand %p1283_p9, %p1280_p8 }
  0x19   :  { %1288 = shalt.err (!%p1285_p10)
}
  0x1a   :  { %s1289_s8 = scalar_lea.vmem %s1379_s15, 2048  ;;  %p1294_p12 = scmp.lt.s32.totalorder %s1379_s15, %s1379_s15 }
  0x1b   :  { %p1290_p11 = scmp.ne.s32.totalorder %s1379_s15, %s1289_s8  ;;  %p1295_p13 = scmp.lt.s32.totalorder %s1289_s8, %s1289_s8 }
  0x1d   :  { %p1296_p0 = por %p1295_p13, %p1294_p12 }
  0x1f   :  { %p1297_p1 = pnand %p1296_p0, %p1290_p11 }
  0x21   :  { %1300 = shalt.err (!%p1297_p1)
}
  0x22   :  { %22 = dma.hbm_to_vmem [thread:$0]  %s1619_s0, 2048, %s1379_s15, [#allocation3], %s1353_s24, %s1353_s24, %s1354_s25  }
  0x23   :  { %s1355_s10 = smov [#allocation7]   ;;  %s1301_s14 = scalar_lea.hbm %s1621_s2, 256 }
  0x24   :  { %s40_s11 = sshll.u32 %s1355_s10, 4  ;;  %p1302_p2 = scmp.ne.s32.totalorder %s1621_s2, %s1301_s14  ;;  %s41_s11 = int_to_ptr.vmem [resolvable:$true] %s40_s11 }
  0x25   :  { %p1305_p3 = scmp.lt.u32.totalorder %s1301_s14, %s1621_s2 }
  0x27   :  { %p1307_p4 = pnand %p1305_p3, %p1302_p2 }
  0x29   :  { %1310 = shalt.err (!%p1307_p4)
}
  0x2a   :  { %s1311_s20 = scalar_lea.vmem %s41_s11, 256  ;;  %p1316_p6 = scmp.lt.s32.totalorder %s41_s11, %s41_s11 }
  0x2b   :  { %p1312_p5 = scmp.ne.s32.totalorder %s41_s11, %s1311_s20  ;;  %p1317_p7 = scmp.lt.s32.totalorder %s1311_s20, %s1311_s20 }
  0x2d   :  { %p1318_p8 = por %p1317_p7, %p1316_p6 }
  0x2f   :  { %p1319_p9 = pnand %p1318_p8, %p1312_p5 }
  0x31   :  { %1322 = shalt.err (!%p1319_p9)
}
  0x32   :  { %46 = dma.hbm_to_vmem [thread:$0]  %s1621_s2, 256, %s41_s11, [#allocation6], %s1353_s24, %s1353_s24, %s1354_s25  }
  0x33   :  { %1345 = dma.done.wait [#allocation3], 2048  }
  0x34   :  { %1346 = vsyncadd [#allocation3], 4294965248 }
  0x35   :  { %1347 = dma.done.wait [#allocation6], 2304  }
  0x36   :  { %1348 = vsyncadd [#allocation6], 4294964992  ;;  %vm90_vm0 = vcmask 261120   ;;  %v72_v1 = vld [vmem:[#allocation5] sm:$0xff]  ;;  %v73_v2 = vld [vmem:[#allocation5 + $0x8] sm:$0xff]  ;;  %vm809_vm3 = vcmask 130048  }
  0x37   :  { %vm1433_vm1 = vmpackc.low %vm90_vm0, %vm90_vm0  ;;  %v74_v3 = vld [vmem:[#allocation5 + $0x10] sm:$0xff]  ;;  %v1201_v4 = vpack.c.bf16 %v73_v2, %v72_v1  ;;  %v75_v5 = vld [vmem:[#allocation5 + $0x18] sm:$0xff]  ;;  %vm981_vm5 = vcmask 130112   ;;  %vm1054_vm6 = vcmask 122880   ;;  %s1356_s2 = smov [#allocation8]  }
  0x38   :  { %v56_v6 = vld [vmem:[#allocation2] sm:$0xff]  ;;  %v1207_v7 = vpack.c.bf16 %v75_v5, %v74_v3  ;;  %v58_v8 = vld [vmem:[#allocation2 + $0x10] sm:$0xff]  ;;  %v77_v10 = vld [vmem:[#allocation5 + $0x28] sm:$0xff]  ;;  %s1068_s21 = sshll.u32 %s1356_s2, 4  ;;  %s1069_s21 = int_to_ptr.vmem [resolvable:$true] %s1068_s21 }
  0x39   :  { %1149 = vmatprep.mubr.msk.f32.mxu0 %vm90_vm0, %v56_v6  ;;  %v76_v9 = vld [vmem:[#allocation5 + $0x20] sm:$0xff]  ;;  %1203 = vmatprep.subr.msk.bf16.mxu0 %vm1433_vm1, %v1201_v4  ;;  %v78_v11 = vld [vmem:[#allocation5 + $0x30] sm:$0xff]  ;;  %v79_v12 = vld [vmem:[#allocation5 + $0x38] sm:$0xff]  ;;  %s1323_s22 = scalar_lea.vmem %s1069_s21, 128  ;;  %p1328_p11 = scmp.lt.s32.totalorder %s1069_s21, %s1069_s21 }
  0x3a   :  { %1156 = vmatprep.mubr.msk.f32.mxu1 %vm90_vm0, %v58_v8  ;;  %1206 = vmatpush3.bf16.xpose.msk.msra.mxu0 %vm1433_vm1, %v1201_v4  ;;  %v1213_v13 = vpack.c.bf16 %v77_v10, %v76_v9  ;;  %v1219_v14 = vpack.c.bf16 %v79_v12, %v78_v11  ;;  %v80_v15 = vld [vmem:[#allocation5 + $0x40] sm:$0xff]  ;;  %v81_v16 = vld [vmem:[#allocation5 + $0x48] sm:$0xff]  ;;  %v82_v18 = vld [vmem:[#allocation5 + $0x50] sm:$0xff]  ;;  %p1324_p10 = scmp.ne.s32.totalorder %s1069_s21, %s1323_s22  ;;  %p1329_p12 = scmp.lt.s32.totalorder %s1323_s22, %s1323_s22 }
  0x3b   :  { %1209 = vmatprep.subr.msk.bf16.mxu1 %vm1433_vm1, %v1207_v7  ;;  %v57_v17 = vld [vmem:[#allocation2 + $0x8] sm:$0xff]  ;;  %v83_v19 = vld [vmem:[#allocation5 + $0x58] sm:$0xff]  ;;  %v60_v21 = vld [vmem:[#allocation2 + $0x20] sm:$0xff]  ;;  %v1225_v22 = vpack.c.bf16 %v81_v16, %v80_v15 }
  0x3c   :  { %1212 = vmatpush3.bf16.xpose.msk.msra.mxu1 %vm1433_vm1, %v1207_v7  ;;  %1215 = vmatprep.subr.msk.bf16.mxu0 %vm1433_vm1, %v1213_v13  ;;  %v59_v20 = vld [vmem:[#allocation2 + $0x18] sm:$0xff]  ;;  %v62_v23 = vld [vmem:[#allocation2 + $0x30] sm:$0xff]  ;;  %v1231_v24 = vpack.c.bf16 %v83_v19, %v82_v18  ;;  %v84_v25 = vld [vmem:[#allocation5 + $0x60] sm:$0xff]  ;;  %p1330_p13 = por %p1329_p12, %p1328_p11 }
  0x3d   :  { %1221 = vmatprep.subr.msk.bf16.mxu1 %vm1433_vm1, %v1219_v14  ;;  %v85_v26 = vld [vmem:[#allocation5 + $0x68] sm:$0xff]  ;;  %v86_v28 = vld [vmem:[#allocation5 + $0x70] sm:$0xff]  ;;  %v87_v29 = vld [vmem:[#allocation5 + $0x78] sm:$0xff] }
  0x3e   :  { %v61_v27 = vld [vmem:[#allocation2 + $0x28] sm:$0xff]  ;;  %v63_v30 = vld [vmem:[#allocation2 + $0x38] sm:$0xff]  ;;  %v64_v31 = vld [vmem:[#allocation2 + $0x40] sm:$0xff]  ;;  %v1237_v32 = vpack.c.bf16 %v85_v26, %v84_v25  ;;  %v1243_v34 = vpack.c.bf16 %v87_v29, %v86_v28  ;;  %p1331_p0 = pnand %p1330_p13, %p1324_p10 }
  0x3f   :  { %v66_v33 = vld [vmem:[#allocation2 + $0x50] sm:$0xff]  ;;  %v65_v35 = vld [vmem:[#allocation2 + $0x48] sm:$0xff]  ;;  %v67_v36 = vld [vmem:[#allocation2 + $0x58] sm:$0xff] }
  0x40   :  { %v68_v37 = vld [vmem:[#allocation2 + $0x60] sm:$0xff]  ;;  %v70_v38 = vld [vmem:[#allocation2 + $0x70] sm:$0xff]  ;;  %v69_v39 = vld [vmem:[#allocation2 + $0x68] sm:$0xff] }
  0x41   :  { %1150 = vmatmul.mubr.msk.f32.vlgmr.msra.gmra.mrb[0].mxu0 %vm90_vm0, %v57_v17  ;;  %v71_v40 = vld [vmem:[#allocation2 + $0x78] sm:$0xff]  ;;  %v1485_v41 = vld [vmem:[#allocation7 + $0x8] sm:$0xff]  ;;  %v1487_v42 = vld [vmem:[#allocation7] sm:$0xff] }
  0x42   :  { %1218 = vmatpush3.bf16.xpose.msk.msra.mxu0 %vm1433_vm1, %v1213_v13  ;;  %1163 = vmatprep.mubr.msk.f32.mxu0 %vm90_vm0, %v60_v21  ;;  %vm788_vm2 = vcmp.gt.f32.partialorder %v1485_v41, 0.0  ;;  %vm787_vm4 = vcmp.gt.f32.partialorder %v1487_v42, 0.0 }
  0x43   :  { %1157 = vmatmul.mubr.msk.f32.vlgmr.msra.gmra.mrb[0].mxu1 %vm90_vm0, %v59_v20  ;;  %1227 = vmatprep.subr.msk.bf16.mxu0 %vm1433_vm1, %v1225_v22 }
  0x44   :  { %1224 = vmatpush3.bf16.xpose.msk.msra.mxu1 %vm1433_vm1, %v1219_v14  ;;  %1170 = vmatprep.mubr.msk.f32.mxu1 %vm90_vm0, %v62_v23 }
  0x45   :  { %1233 = vmatprep.subr.msk.bf16.mxu1 %vm1433_vm1, %v1231_v24 }
  0x49   :  { %1164 = vmatmul.mubr.msk.f32.vlgmr.msra.gmra.mrb[2].mxu0 %vm90_vm0, %v61_v27 }
  0x4a   :  { %1230 = vmatpush3.bf16.xpose.msk.msra.mxu0 %vm1433_vm1, %v1225_v22  ;;  %1177 = vmatprep.mubr.msk.f32.mxu0 %vm90_vm0, %v64_v31 }
  0x4b   :  { %1171 = vmatmul.mubr.msk.f32.vlgmr.msra.gmra.mrb[2].mxu1 %vm90_vm0, %v63_v30  ;;  %1239 = vmatprep.subr.msk.bf16.mxu0 %vm1433_vm1, %v1237_v32 }
  0x4c   :  { %1236 = vmatpush3.bf16.xpose.msk.msra.mxu1 %vm1433_vm1, %v1231_v24  ;;  %1184 = vmatprep.mubr.msk.f32.mxu1 %vm90_vm0, %v66_v33 }
  0x4d   :  { %1245 = vmatprep.subr.msk.bf16.mxu1 %vm1433_vm1, %v1243_v34 }
  0x51   :  { %1178 = vmatmul.mubr.msk.f32.vlgmr.msra.gmra.mrb[4].mxu0 %vm90_vm0, %v65_v35 }
  0x52   :  { %1242 = vmatpush3.bf16.xpose.msk.msra.mxu0 %vm1433_vm1, %v1237_v32  ;;  %1191 = vmatprep.mubr.msk.f32.mxu0 %vm90_vm0, %v68_v37 }
  0x53   :  { %1185 = vmatmul.mubr.msk.f32.vlgmr.msra.gmra.mrb[4].mxu1 %vm90_vm0, %v67_v36 }
  0x54   :  { %1248 = vmatpush3.bf16.xpose.msk.msra.mxu1 %vm1433_vm1, %v1243_v34  ;;  %1198 = vmatprep.mubr.msk.f32.mxu1 %vm90_vm0, %v70_v38 }
  0x59   :  { %1192 = vmatmul.mubr.msk.f32.vlgmr.msra.gmra.mrb[6].mxu0 %vm90_vm0, %v69_v39 }
  0x5b   :  { %1199 = vmatmul.mubr.msk.f32.vlgmr.msra.gmra.mrb[6].mxu1 %vm90_vm0, %v71_v40 }
 0x114   :  { %v1151_v43 = vpop.f32.mrb[0].mxu0 }
 0x115   :  { %v169_v44 = vpop.f32.mrb[1].mxu0  ;;  %v794_v45 = vsel %vm788_vm2, %v1151_v43, -inf  ;;  %v859_v47 = vmul.f32 %v1151_v43, %v1485_v41 }
 0x116   :  { %v1158_v46 = vpop.f32.mrb[0].mxu1  ;;  %v813_v48 = vsel %vm809_vm3, %v794_v45, -inf  ;;  %v793_v53 = vsel %vm787_vm4, %v169_v44, -inf  ;;  %v858_v63 = vmul.f32 %v169_v44, %v1487_v42 }
 0x117   :  { %v256_v49 = vpop.f32.mrb[1].mxu1  ;;  %v796_v50 = vsel %vm788_vm2, %v1158_v46, -inf  ;;  %814 = vmax.xlane.f32.xlu1 %v813_v48  ;;  %v877_v51 = vsel %vm809_vm3, %v859_v47, 0.0  ;;  %v861_v54 = vmul.f32 %v1158_v46, %v1485_v41  ;;  %v810_v55 = vsel %vm809_vm3, %v793_v53, -inf }
 0x118   :  { %878 = vadd.xlane.f32.xlu0 %v877_v51  ;;  %v819_v52 = vsel %vm809_vm3, %v796_v50, -inf  ;;  %v795_v56 = vsel %vm787_vm4, %v256_v49, -inf  ;;  %v860_v60 = vmul.f32 %v256_v49, %v1487_v42  ;;  %v874_v4 = vsel %vm809_vm3, %v858_v63, 0.0 }
 0x119   :  { %v883_v61 = vsel %vm809_vm3, %v861_v54, 0.0  ;;  %v816_v0 = vsel %vm809_vm3, %v795_v56, -inf  ;;  %v970_v63 = vlaneseq }
 0x11a   :  { %v880_v2 = vsel %vm809_vm3, %v860_v60, 0.0 }
 0x11b   :  { %820 = vmax.xlane.f32.xlu1 %v819_v52 }
 0x11c   :  { %811 = vmax.xlane.f32.xlu0 %v810_v55  ;;  %v1165_v57 = vpop.f32.mrb[2].mxu0 }
 0x11d   :  { %v343_v58 = vpop.f32.mrb[3].mxu0  ;;  %v798_v1 = vsel %vm788_vm2, %v1165_v57, -inf  ;;  %v863_v15 = vmul.f32 %v1165_v57, %v1485_v41 }
 0x11e   :  { %v1172_v59 = vpop.f32.mrb[2].mxu1  ;;  %v797_v3 = vsel %vm787_vm4, %v343_v58, -inf  ;;  %v825_v5 = vsel %vm809_vm3, %v798_v1, -inf  ;;  %v862_v16 = vmul.f32 %v343_v58, %v1487_v42 }
 0x11f   :  { %v430_v62 = vpop.f32.mrb[3].mxu1  ;;  %884 = vadd.xlane.f32.xlu1 %v883_v61  ;;  %v822_v7 = vsel %vm809_vm3, %v797_v3, -inf  ;;  %v800_v8 = vsel %vm788_vm2, %v1172_v59, -inf  ;;  %v865_v20 = vmul.f32 %v1172_v59, %v1485_v41  ;;  %v889_v21 = vsel %vm809_vm3, %v863_v15, 0.0 }
 0x120   :  { %817 = vmax.xlane.f32.xlu0 %v816_v0  ;;  %v799_v11 = vsel %vm787_vm4, %v430_v62, -inf  ;;  %v831_v13 = vsel %vm809_vm3, %v800_v8, -inf  ;;  %v864_v23 = vmul.f32 %v430_v62, %v1487_v42  ;;  %v886_v24 = vsel %vm809_vm3, %v862_v16, 0.0 }
 0x121   :  { %v828_v14 = vsel %vm809_vm3, %v799_v11, -inf  ;;  %v895_v26 = vsel %vm809_vm3, %v865_v20, 0.0 }
 0x122   :  { %v892_v28 = vsel %vm809_vm3, %v864_v23, 0.0 }
 0x123   :  { %881 = vadd.xlane.f32.xlu1 %v880_v2  ;;  %v971_v2 = vand.u32 127, %v970_v63 }
 0x124   :  { %875 = vadd.xlane.f32.xlu0 %v874_v4  ;;  %v1179_v6 = vpop.f32.mrb[4].mxu0 }
 0x125   :  { %v517_v9 = vpop.f32.mrb[5].mxu0  ;;  %v802_v25 = vsel %vm788_vm2, %v1179_v6, -inf  ;;  %v867_v35 = vmul.f32 %v1179_v6, %v1485_v41  ;;  %v976_v6 = vadd.s32 4294967288, %v971_v2 }
 0x126   :  { %v1186_v10 = vpop.f32.mrb[4].mxu1  ;;  %v801_v27 = vsel %vm787_vm4, %v517_v9, -inf  ;;  %v837_v29 = vsel %vm809_vm3, %v802_v25, -inf  ;;  %v866_v36 = vmul.f32 %v517_v9, %v1487_v42 }
 0x127   :  { %v604_v12 = vpop.f32.mrb[5].mxu1  ;;  %826 = vmax.xlane.f32.xlu1 %v825_v5  ;;  %v834_v30 = vsel %vm809_vm3, %v801_v27, -inf  ;;  %v804_v31 = vsel %vm788_vm2, %v1186_v10, -inf  ;;  %v869_v37 = vmul.f32 %v1186_v10, %v1485_v41  ;;  %v901_v38 = vsel %vm809_vm3, %v867_v35, 0.0 }
 0x128   :  { %823 = vmax.xlane.f32.xlu0 %v822_v7  ;;  %v803_v32 = vsel %vm787_vm4, %v604_v12, -inf  ;;  %v843_v33 = vsel %vm809_vm3, %v804_v31, -inf  ;;  %v868_v39 = vmul.f32 %v604_v12, %v1487_v42  ;;  %v898_v40 = vsel %vm809_vm3, %v866_v36, 0.0 }
 0x129   :  { %v840_v34 = vsel %vm809_vm3, %v803_v32, -inf  ;;  %v907_v44 = vsel %vm809_vm3, %v869_v37, 0.0  ;;  %v973_v5 = vshrl.u32 %v970_v63, 7 }
 0x12a   :  { %v904_v46 = vsel %vm809_vm3, %v868_v39, 0.0 }
 0x12b   :  { %832 = vmax.xlane.f32.xlu1 %v831_v13  ;;  %v1571_v9 = vsub.s32 %v971_v2, %v973_v5  ;;  %v1573_v12 = vsub.s32 %v976_v6, %v973_v5 }
 0x12c   :  { %829 = vmax.xlane.f32.xlu0 %v828_v14  ;;  %v1193_v17 = vpop.f32.mrb[6].mxu0 }
 0x12d   :  { %v691_v18 = vpop.f32.mrb[7].mxu0  ;;  %v806_v43 = vsel %vm788_vm2, %v1193_v17, -inf  ;;  %v871_v49 = vmul.f32 %v1193_v17, %v1485_v41 }
 0x12e   :  { %v1200_v19 = vpop.f32.mrb[6].mxu1  ;;  %v805_v45 = vsel %vm787_vm4, %v691_v18, -inf  ;;  %v849_v47 = vsel %vm809_vm3, %v806_v43, -inf  ;;  %v870_v50 = vmul.f32 %v691_v18, %v1487_v42 }
 0x12f   :  { %v778_v22 = vpop.f32.mrb[7].mxu1  ;;  %890 = vadd.xlane.f32.xlu1 %v889_v21  ;;  %v846_v48 = vsel %vm809_vm3, %v805_v45, -inf  ;;  %v873_v51 = vmul.f32 %v1200_v19, %v1485_v41  ;;  %v913_v53 = vsel %vm809_vm3, %v871_v49, 0.0  ;;  %v808_v57 = vsel %vm788_vm2, %v1200_v19, -inf }
 0x130   :  { %887 = vadd.xlane.f32.xlu0 %v886_v24  ;;  %v872_v52 = vmul.f32 %v778_v22, %v1487_v42  ;;  %v910_v54 = vsel %vm809_vm3, %v870_v50, 0.0  ;;  %v807_v58 = vsel %vm787_vm4, %v778_v22, -inf  ;;  %v855_v59 = vsel %vm809_vm3, %v808_v57, -inf }
 0x131   :  { %v919_v55 = vsel %vm809_vm3, %v873_v51, 0.0  ;;  %v852_v60 = vsel %vm809_vm3, %v807_v58, -inf }
 0x132   :  { %v916_v56 = vsel %vm809_vm3, %v872_v52, 0.0 }
 0x133   :  { %896 = vadd.xlane.f32.xlu1 %v895_v26 }
 0x134   :  { %893 = vadd.xlane.f32.xlu0 %v892_v28 }
 0x137   :  { %838 = vmax.xlane.f32.xlu1 %v837_v29 }
 0x138   :  { %835 = vmax.xlane.f32.xlu0 %v834_v30 }
 0x13b   :  { %844 = vmax.xlane.f32.xlu1 %v843_v33 }
 0x13c   :  { %841 = vmax.xlane.f32.xlu0 %v840_v34 }
 0x13f   :  { %902 = vadd.xlane.f32.xlu1 %v901_v38 }
 0x140   :  { %899 = vadd.xlane.f32.xlu0 %v898_v40 }
 0x143   :  { %908 = vadd.xlane.f32.xlu1 %v907_v44 }
 0x144   :  { %905 = vadd.xlane.f32.xlu0 %v904_v46 }
 0x147   :  { %850 = vmax.xlane.f32.xlu1 %v849_v47 }
 0x148   :  { %847 = vmax.xlane.f32.xlu0 %v846_v48 }
 0x14b   :  { %914 = vadd.xlane.f32.xlu1 %v913_v53 }
 0x14c   :  { %911 = vadd.xlane.f32.xlu0 %v910_v54 }
 0x14f   :  { %920 = vadd.xlane.f32.xlu1 %v919_v55 }
 0x150   :  { %917 = vadd.xlane.f32.xlu0 %v916_v56 }
 0x153   :  { %856 = vmax.xlane.f32.xlu1 %v855_v59 }
 0x154   :  { %853 = vmax.xlane.f32.xlu0 %v852_v60 }
 0x1a4   :  { %v815_v61 = vpop.xlane.xlu1 %814 }
 0x1a5   :  { %v879_v62 = vpop.xlane.xlu0 %878 }
 0x1a6   :  { %v923_v42 = vmul.f32 0.0625, %v879_v62 }
 0x1a8   :  { %v821_v0 = vpop.xlane.xlu1 %820  ;;  %v939_v13 = vsub.f32 %v815_v61, %v923_v42 }
 0x1a9   :  { %v812_v1 = vpop.xlane.xlu0 %811 }
 0x1aa   :  { %v980_v21 = vrot.slane %v939_v13, %v1573_v12 }
 0x1ac   :  { %v885_v3 = vpop.xlane.xlu1 %884 }
 0x1ad   :  { %v925_v4 = vmul.f32 0.0625, %v885_v3  ;;  %v818_v41 = vpop.xlane.xlu0 %817 }
 0x1af   :  { %v941_v8 = vsub.f32 %v821_v0, %v925_v4 }
 0x1b0   :  { %v882_v7 = vpop.xlane.xlu1 %881 }
 0x1b1   :  { %v924_v10 = vmul.f32 0.0625, %v882_v7  ;;  %v876_v11 = vpop.xlane.xlu0 %875  ;;  %v990_v18 = vrot.slane %v941_v8, %v1573_v12 }
 0x1b2   :  { %v922_v14 = vmul.f32 0.0625, %v876_v11 }
 0x1b3   :  { %v940_v15 = vsub.f32 %v818_v41, %v924_v10 }
 0x1b4   :  { %v938_v16 = vsub.f32 %v812_v1, %v922_v14  ;;  %v827_v17 = vpop.xlane.xlu1 %826 }
 0x1b5   :  { %v986_v19 = vrot.slane %v940_v15, %v1571_v9  ;;  %v824_v20 = vpop.xlane.xlu0 %823 }
 0x1b6   :  { %v975_v22 = vrot.slane %v938_v16, %v1571_v9 }
 0x1b7   :  { %v991_v23 = vsel %vm981_vm5, %v990_v18, %v986_v19 }
 0x1b8   :  { %1056 = vst.msk [vmem:[#allocation8 + $0x1] sm:$0x1] %vm1054_vm6, %v991_v23  ;;  %v982_v24 = vsel %vm981_vm5, %v980_v21, %v975_v22  ;;  %v833_v25 = vpop.xlane.xlu1 %832 }
 0x1b9   :  { %1055 = vst.msk [vmem:[#allocation8] sm:$0x1] %vm1054_vm6, %v982_v24  ;;  %v830_v26 = vpop.xlane.xlu0 %829 }
 0x1bc   :  { %v891_v27 = vpop.xlane.xlu1 %890 }
 0x1bd   :  { %v927_v28 = vmul.f32 0.0625, %v891_v27  ;;  %v888_v29 = vpop.xlane.xlu0 %887 }
 0x1be   :  { %v926_v30 = vmul.f32 0.0625, %v888_v29 }
 0x1bf   :  { %v943_v31 = vsub.f32 %v827_v17, %v927_v28 }
 0x1c0   :  { %v942_v32 = vsub.f32 %v824_v20, %v926_v30  ;;  %v897_v33 = vpop.xlane.xlu1 %896 }
 0x1c1   :  { %v999_v34 = vrot.slane %v943_v31, %v1573_v12  ;;  %v929_v35 = vmul.f32 0.0625, %v897_v33  ;;  %v894_v36 = vpop.xlane.xlu0 %893 }
 0x1c2   :  { %v995_v37 = vrot.slane %v942_v32, %v1571_v9  ;;  %v928_v38 = vmul.f32 0.0625, %v894_v36 }
 0x1c3   :  { %v945_v39 = vsub.f32 %v833_v25, %v929_v35 }
 0x1c4   :  { %v1000_v40 = vsel %vm981_vm5, %v999_v34, %v995_v37  ;;  %v944_v43 = vsub.f32 %v830_v26, %v928_v38  ;;  %v839_v44 = vpop.xlane.xlu1 %838 }
 0x1c5   :  { %1057 = vst.msk [vmem:[#allocation8 + $0x2] sm:$0x1] %vm1054_vm6, %v1000_v40  ;;  %v1008_v45 = vrot.slane %v945_v39, %v1573_v12  ;;  %v836_v46 = vpop.xlane.xlu0 %835 }
 0x1c6   :  { %v1004_v47 = vrot.slane %v944_v43, %v1571_v9 }
 0x1c8   :  { %v1009_v48 = vsel %vm981_vm5, %v1008_v45, %v1004_v47  ;;  %v845_v49 = vpop.xlane.xlu1 %844 }
 0x1c9   :  { %1058 = vst.msk [vmem:[#allocation8 + $0x3] sm:$0x1] %vm1054_vm6, %v1009_v48  ;;  %v842_v50 = vpop.xlane.xlu0 %841 }
 0x1cc   :  { %v903_v51 = vpop.xlane.xlu1 %902 }
 0x1cd   :  { %v931_v52 = vmul.f32 0.0625, %v903_v51  ;;  %v900_v53 = vpop.xlane.xlu0 %899 }
 0x1ce   :  { %v930_v54 = vmul.f32 0.0625, %v900_v53 }
 0x1cf   :  { %v947_v55 = vsub.f32 %v839_v44, %v931_v52 }
 0x1d0   :  { %v946_v56 = vsub.f32 %v836_v46, %v930_v54  ;;  %v909_v57 = vpop.xlane.xlu1 %908 }
 0x1d1   :  { %v1017_v58 = vrot.slane %v947_v55, %v1573_v12  ;;  %v933_v59 = vmul.f32 0.0625, %v909_v57  ;;  %v906_v60 = vpop.xlane.xlu0 %905 }
 0x1d2   :  { %v1013_v61 = vrot.slane %v946_v56, %v1571_v9  ;;  %v932_v62 = vmul.f32 0.0625, %v906_v60 }
 0x1d3   :  { %v949_v63 = vsub.f32 %v845_v49, %v933_v59 }
 0x1d4   :  { %v1018_v0 = vsel %vm981_vm5, %v1017_v58, %v1013_v61  ;;  %v948_v1 = vsub.f32 %v842_v50, %v932_v62  ;;  %v851_v2 = vpop.xlane.xlu1 %850 }
 0x1d5   :  { %1059 = vst.msk [vmem:[#allocation8 + $0x4] sm:$0x1] %vm1054_vm6, %v1018_v0  ;;  %v1026_v3 = vrot.slane %v949_v63, %v1573_v12  ;;  %v848_v4 = vpop.xlane.xlu0 %847 }
 0x1d6   :  { %v1022_v41 = vrot.slane %v948_v1, %v1571_v9 }
 0x1d8   :  { %v1027_v5 = vsel %vm981_vm5, %v1026_v3, %v1022_v41  ;;  %v915_v6 = vpop.xlane.xlu1 %914 }
 0x1d9   :  { %1060 = vst.msk [vmem:[#allocation8 + $0x5] sm:$0x1] %vm1054_vm6, %v1027_v5  ;;  %v935_v42 = vmul.f32 0.0625, %v915_v6  ;;  %v912_v7 = vpop.xlane.xlu0 %911 }
 0x1da   :  { %v934_v8 = vmul.f32 0.0625, %v912_v7 }
 0x1db   :  { %v951_v10 = vsub.f32 %v851_v2, %v935_v42 }
 0x1dc   :  { %v950_v11 = vsub.f32 %v848_v4, %v934_v8  ;;  %v921_v13 = vpop.xlane.xlu1 %920 }
 0x1dd   :  { %v1035_v14 = vrot.slane %v951_v10, %v1573_v12  ;;  %v918_v15 = vpop.xlane.xlu0 %917  ;;  %v937_v17 = vmul.f32 0.0625, %v921_v13 }
 0x1de   :  { %v1031_v16 = vrot.slane %v950_v11, %v1571_v9  ;;  %v936_v19 = vmul.f32 0.0625, %v918_v15 }
 0x1e0   :  { %v1036_v18 = vsel %vm981_vm5, %v1035_v14, %v1031_v16  ;;  %v857_v20 = vpop.xlane.xlu1 %856 }
 0x1e1   :  { %1061 = vst.msk [vmem:[#allocation8 + $0x6] sm:$0x1] %vm1054_vm6, %v1036_v18  ;;  %v953_v21 = vsub.f32 %v857_v20, %v937_v17  ;;  %v854_v22 = vpop.xlane.xlu0 %853 }
 0x1e2   :  { %v952_v23 = vsub.f32 %v854_v22, %v936_v19 }
 0x1e3   :  { %v1044_v24 = vrot.slane %v953_v21, %v1573_v12 }
 0x1e4   :  { %v1040_v25 = vrot.slane %v952_v23, %v1571_v9 }
 0x1e6   :  { %v1045_v26 = vsel %vm981_vm5, %v1044_v24, %v1040_v25 }
 0x1e7   :  { %1062 = vst.msk [vmem:[#allocation8 + $0x7] sm:$0x1] %vm1054_vm6, %v1045_v26 }
 0x1e8   :  { %1334 = shalt.err (!%p1331_p0)
}
 0x1e9   :  { %s1335_s25 = scalar_lea.hbm %s1622_s3, 128 }
 0x1ea   :  { %p1336_p1 = scmp.ne.s32.totalorder %s1622_s3, %s1335_s25  ;;  %p1339_p2 = scmp.lt.u32.totalorder %s1335_s25, %s1622_s3 }
 0x1ec   :  { %p1341_p3 = pnand %p1339_p2, %p1336_p1 }
 0x1ee   :  { %1344 = shalt.err (!%p1341_p3)
}
 0x1ef   :  { %s1357_s30 = smov 16   ;;  %s1358_s4 = smov 1  }
 0x1f0   :  { %1074 = dma.vmem_to_hbm [thread:$0]  %s1069_s21, 128, %s1622_s3, [#allocation4], %s1357_s30, %s1357_s30, %s1358_s4  }
 0x1f1   :  { %1349 = dma.done.wait [#allocation4], 128  }
 0x1f2   :  { %1350 = vsyncadd [#allocation4], 4294967168 }
 0x1f3   :  { %1078 = vsyncpa [#allocation3], 1 }
 0x1f4   :  { %1079 = vsyncpa [#allocation6], 1 }
 0x1f5   :  { %1080 = vsyncpa [#allocation4], 1 }

</bundles_post_ra>
